<compile_context>
chip_gen: v7x
topology: tpu7x:2x2x1
jax: 0.10.0
libtpu: 0.0.40
codegen_flags: <defaults>
</compile_context>

<pallas_src>
import math
from functools import partial

import jax
import jax.numpy as jnp
from jax.experimental import pallas as pl
from jax.experimental.pallas import tpu as pltpu


def _gelu_tanh(x):
    # Matches F.gelu(x, approximate='tanh'); tanh rides the EUP slot.
    c = math.sqrt(2.0 / math.pi)
    return 0.5 * x * (1.0 + jnp.tanh(c * (x + 0.044715 * x * x * x)))


def _round_up(n, m):
    return ((n + m - 1) // m) * m


# ----------------------------- kernel bodies -----------------------------

def _ffn_kernel_resident(x_ref, w1_ref, b1_ref, w2_ref, b2_ref, o_ref):
    # Whole hidden dim in one body; W1/W2/b1/b2 resident across row tiles.
    # x_ref: (tm, Cp) bf16; w1_ref: (Cp, Hp) bf16; w2_ref: (Hp, Cp) bf16;
    # biases f32; o_ref: (tm, Cp) in the caller's dtype.
    h = jnp.dot(x_ref[...], w1_ref[...], preferred_element_type=jnp.float32)
    h = _gelu_tanh(h + b1_ref[...])                      # f32 epilogue
    y = jnp.dot(h.astype(w2_ref.dtype), w2_ref[...],
                preferred_element_type=jnp.float32)
    o_ref[...] = (y + b2_ref[...]).astype(o_ref.dtype)


def _ffn_kernel_ktiled(x_ref, w1_ref, b1_ref, w2_ref, b2_ref, o_ref, acc_ref):
    # Hidden dim chunked on the trailing ("arbitrary") grid axis; resident f32
    # accumulator with pl.when init/finalize.
    k = pl.program_id(1)

    @pl.when(k == 0)
    def _init():
        acc_ref[...] = jnp.zeros_like(acc_ref)

    h = jnp.dot(x_ref[...], w1_ref[...], preferred_element_type=jnp.float32)
    h = _gelu_tanh(h + b1_ref[...])
    acc_ref[...] += jnp.dot(h.astype(w2_ref.dtype), w2_ref[...],
                            preferred_element_type=jnp.float32)

    @pl.when(k == pl.num_programs(1) - 1)
    def _finalize():
        o_ref[...] = (acc_ref[...] + b2_ref[...]).astype(o_ref.dtype)


# --------------------------- parameter prep ---------------------------

def prepare_ffn_params(w1, b1, w2, b2, compute_dtype=jnp.bfloat16):
    """Pad lane dims to multiples of 128 and cast MXU operands to bf16 ONCE.

    Call at parameter-load time (outside the per-call hot path).
    w1: [C, H], b1: [H], w2: [H, C], b2: [C]  ([in, out] layout, i.e. the
    transpose of torch.nn.Linear's weight).
    """
    C, H = w1.shape
    Cp, Hp = _round_up(C, 128), _round_up(H, 128)
    w1p = jnp.pad(w1, ((0, Cp - C), (0, Hp - H))).astype(compute_dtype)
    w2p = jnp.pad(w2, ((0, Hp - H), (0, Cp - C))).astype(compute_dtype)
    b1p = jnp.pad(b1, (0, Hp - H)).reshape(1, Hp).astype(jnp.float32)
    b2p = jnp.pad(b2, (0, Cp - C)).reshape(1, Cp).astype(jnp.float32)
    return {"w1": w1p, "b1": b1p, "w2": w2p, "b2": b2p, "C": int(C), "H": int(H)}


def _chip_tuning():
    """(tm, th, vmem_limit_bytes) defaults for the attached TPU generation."""
    vmem = None
    try:
        vmem = int(pltpu.get_tpu_info().vmem_capacity_bytes)
    except Exception:
        vmem = None
    if vmem is None:
        return 512, 512, 64 * 1024 * 1024
    if vmem <= 96 * 1024 * 1024:
        # v7x-like: 64 MiB / TensorCore. Leave headroom for compiler scratch.
        return 512, 256, max(vmem - 12 * 1024 * 1024, 32 * 1024 * 1024)
    # v5e / v6e: 128 MiB physical VMEM.
    return 768, 512, 100 * 1024 * 1024


# ------------------------------- impl -------------------------------

@partial(jax.jit,
         static_argnames=("tm_eff", "th_eff", "use_resident", "vmem_limit"))
def _ffn_impl(x, w1p, b1p, w2p, b2p, *, tm_eff, th_eff, use_resident,
              vmem_limit):
    B, T, C = x.shape
    Cp, Hp = w1p.shape
    M = B * T
    Mp = _round_up(M, tm_eff)
    n_row = Mp // tm_eff
    cdt = w1p.dtype
    out_bytes = jnp.dtype(x.dtype).itemsize

    x2d = x.reshape(M, C)
    if (Mp, Cp) != (M, C):
        x2d = jnp.pad(x2d, ((0, Mp - M), (0, Cp - C)))
    x2d = x2d.astype(cdt)

    wbytes = (w1p.size + w2p.size) * jnp.dtype(cdt).itemsize
    act_bytes = (x2d.size * jnp.dtype(cdt).itemsize
                 + Mp * Cp * out_bytes
                 + (b1p.size + b2p.size) * 4)
    flops = 4 * M * C * Hp          # two matmuls
    transcendentals = M * Hp        # one tanh per hidden activation

    if use_resident:
        cost = pl.CostEstimate(flops=flops, transcendentals=transcendentals,
                               bytes_accessed=act_bytes + wbytes)
        out2d = pl.pallas_call(
            _ffn_kernel_resident,
            out_shape=jax.ShapeDtypeStruct((Mp, Cp), x.dtype),
            grid_spec=pltpu.PrefetchScalarGridSpec(
                num_scalar_prefetch=0,
                grid=(n_row,),
                in_specs=[
                    pl.BlockSpec((tm_eff, Cp), lambda i: (i, 0)),  # x rows
                    pl.BlockSpec((Cp, Hp), lambda i: (0, 0)),      # W1 resident
                    pl.BlockSpec((1, Hp), lambda i: (0, 0)),       # b1 resident
                    pl.BlockSpec((Hp, Cp), lambda i: (0, 0)),      # W2 resident
                    pl.BlockSpec((1, Cp), lambda i: (0, 0)),       # b2 resident
                ],
                out_specs=pl.BlockSpec((tm_eff, Cp), lambda i: (i, 0)),
            ),
            compiler_params=pltpu.CompilerParams(
                dimension_semantics=("parallel",),
                vmem_limit_bytes=int(vmem_limit),
            ),
            cost_estimate=cost,
        )(x2d, w1p, b1p, w2p, b2p)
    else:
        # Large-C fallback: chunk the hidden dim (reduction axis last).
        cost = pl.CostEstimate(
            flops=flops, transcendentals=transcendentals,
            bytes_accessed=act_bytes + n_row * wbytes)  # weights per row tile
        out2d = pl.pallas_call(
            _ffn_kernel_ktiled,
            out_shape=jax.ShapeDtypeStruct((Mp, Cp), x.dtype),
            grid_spec=pltpu.PrefetchScalarGridSpec(
                num_scalar_prefetch=0,
                grid=(n_row, Hp // th_eff),
                in_specs=[
                    pl.BlockSpec((tm_eff, Cp), lambda i, k: (i, 0)),
                    pl.BlockSpec((Cp, th_eff), lambda i, k: (0, k)),
                    pl.BlockSpec((1, th_eff), lambda i, k: (0, k)),
                    pl.BlockSpec((th_eff, Cp), lambda i, k: (k, 0)),
                    pl.BlockSpec((1, Cp), lambda i, k: (0, 0)),
                ],
                out_specs=pl.BlockSpec((tm_eff, Cp), lambda i, k: (i, 0)),
                scratch_shapes=[pltpu.VMEM((tm_eff, Cp), jnp.float32)],
            ),
            compiler_params=pltpu.CompilerParams(
                dimension_semantics=("parallel", "arbitrary"),
                vmem_limit_bytes=int(vmem_limit),
            ),
            cost_estimate=cost,
        )(x2d, w1p, b1p, w2p, b2p)

    return out2d[:M, :C].reshape(B, T, C)


def feed_forward(x, params, *, tm=None, th=None):
    """Fused MLP: gelu_tanh(x @ W1 + b1) @ W2 + b2  (dropout p=0.0 -> identity).

    x: [B, T, C]; `params` from prepare_ffn_params (pre-padded bf16 weights).
    """
    C = params["C"]
    assert x.shape[-1] == C
    w1p, b1p, w2p, b2p = params["w1"], params["b1"], params["w2"], params["b2"]
    Cp, Hp = w1p.shape
    B, T, _ = x.shape
    M = B * T

    tm_d, th_d, vmem_limit = _chip_tuning()
    tm = tm_d if tm is None else tm
    th = th_d if th is None else th

    # Row tile: multiple of 16 (bf16 sublane packing), capped at tm.
    tm_eff = min(tm, _round_up(M, 16))
    # v7x megacore: if there is real work but only one row tile, split it so
    # both TensorCores are busy on the "parallel" row axis.
    if M >= 256 and M <= tm_eff:
        tm_eff = _round_up((M + 1) // 2, 16)
    Mp = _round_up(M, tm_eff)

    # Hidden chunk for the k-tiled fallback: multiple of 128 dividing Hp.
    th_eff = min(_round_up(th, 128), Hp)
    while Hp % th_eff:
        th_eff -= 128

    # Resident-weights path when its conservative VMEM footprint fits
    # (double-buffered weights + x/out tiles + f32 intermediate).
    out_bytes = jnp.dtype(x.dtype).itemsize
    resident_vmem = (
        2 * 2 * (2 * Cp * Hp)            # W1 + W2 bf16, double-buffered
        + 2 * tm_eff * Cp * 2            # x tiles (bf16, double-buffered)
        + 2 * tm_eff * Cp * out_bytes    # out tiles (double-buffered)
        + tm_eff * Hp * (4 + 2)          # f32 intermediate + bf16 copy
        + 8 * (Hp + Cp)                  # biases
    )
    use_resident = resident_vmem <= int(0.9 * vmem_limit)

    return _ffn_impl(x, w1p, b1p, w2p, b2p,
                     tm_eff=int(tm_eff), th_eff=int(th_eff),
                     use_resident=bool(use_resident),
                     vmem_limit=int(vmem_limit))


# ------------------------------ reference ------------------------------

def reference(x, w1, b1, w2, b2):
    # Same math as the PyTorch module with the kernel's precision recipe
    # (bf16 matmul operands, f32 accumulation / bias / GELU).
    cdt = jnp.bfloat16
    xb = x.astype(cdt).astype(jnp.float32)
    w1b = w1.astype(cdt).astype(jnp.float32)
    w2b = w2.astype(cdt).astype(jnp.float32)
    h = jnp.einsum("btc,ch->bth", xb, w1b) + b1
    h = _gelu_tanh(h)
    h = h.astype(cdt).astype(jnp.float32)
    y = jnp.einsum("bth,hc->btc", h, w2b) + b2
    return y  # dropout p=0.0 -> identity


if __name__ == "__main__":
    # Config: n_embd=32, bias=True, dropout=0.0 (eval mode).
    B, T, C = 2, 8, 32
    H = 4 * C

    key = jax.random.PRNGKey(0)
    kx, k1, kb1, k2, kb2 = jax.random.split(key, 5)

    x = jax.random.normal(kx, (B, T, C), dtype=jnp.float32)
    # Deterministic init (roughly nn.Linear's uniform fan-in scaling).
    w1 = jax.random.uniform(k1, (C, H), minval=-1.0, maxval=1.0,
                            dtype=jnp.float32) / math.sqrt(C)
    b1 = jax.random.uniform(kb1, (H,), minval=-1.0, maxval=1.0,
                            dtype=jnp.float32) / math.sqrt(C)
    w2 = jax.random.uniform(k2, (H, C), minval=-1.0, maxval=1.0,
                            dtype=jnp.float32) / math.sqrt(H)
    b2 = jax.random.uniform(kb2, (C,), minval=-1.0, maxval=1.0,
                            dtype=jnp.float32) / math.sqrt(H)

    # Pad/cast weights ONCE (hoisted out of the per-call hot path).
    params = jax.tree_util.tree_map(
        lambda a: jax.block_until_ready(a) if isinstance(a, jax.Array) else a,
        prepare_ffn_params(w1, b1, w2, b2))

    out = feed_forward(x, params)
    out = jax.block_until_ready(out)
    assert out.shape == (B, T, C)

    ref = reference(x, w1, b1, w2, b2)
    assert jnp.allclose(out, ref, atol=2e-2, rtol=2e-2), "mismatch vs reference"

    print("KERNEL_OK")
</pallas_src>

<mosaic_0001>
module attributes {stable_mosaic.version = 11 : i64} {
  func.func @_ffn_kernel_resident(%arg0: i32, %arg1: memref<16x128xbf16, #tpu.memory_space<vmem>>, %arg2: memref<128x128xbf16, #tpu.memory_space<vmem>>, %arg3: memref<1x128xf32, #tpu.memory_space<vmem>>, %arg4: memref<128x128xbf16, #tpu.memory_space<vmem>>, %arg5: memref<1x128xf32, #tpu.memory_space<vmem>>, %arg6: memref<16x128xf32, #tpu.memory_space<vmem>>) attributes {dimension_semantics = [#tpu.dimension_semantics<parallel>], iteration_bounds = array<i64: 1>, scalar_prefetch = 0 : i64, scratch_operands = 0 : i64, tpu.core_type = #tpu.core_type<tc>, window_params = [{transform_indices = @transform_0, window_bounds = array<i64: 16, 128>}, {pipeline_mode = #tpu.pipeline_mode<synchronous>, transform_indices = @transform_1, window_bounds = array<i64: 128, 128>}, {pipeline_mode = #tpu.pipeline_mode<synchronous>, transform_indices = @transform_2, window_bounds = array<i64: 1, 128>}, {pipeline_mode = #tpu.pipeline_mode<synchronous>, transform_indices = @transform_3, window_bounds = array<i64: 128, 128>}, {pipeline_mode = #tpu.pipeline_mode<synchronous>, transform_indices = @transform_4, window_bounds = array<i64: 1, 128>}, {transform_indices = @transform_5, window_bounds = array<i64: 16, 128>}]} {
    %c0 = arith.constant 0 : index
    %c0_0 = arith.constant 0 : index
    %0 = vector.load %arg1[%c0, %c0_0] : memref<16x128xbf16, #tpu.memory_space<vmem>>, vector<16x128xbf16>
    %c0_1 = arith.constant 0 : index
    %c0_2 = arith.constant 0 : index
    %1 = vector.load %arg2[%c0_1, %c0_2] : memref<128x128xbf16, #tpu.memory_space<vmem>>, vector<128x128xbf16>
    %cst = arith.constant dense<0.000000e+00> : vector<16x128xf32>
    %2 = tpu.matmul %0, %1, %cst {dimension_numbers = #tpu.dot_dimension_numbers<[1], [0], [0], [1], [0, 0, 1, 1], [], []>} : vector<16x128xbf16>, vector<128x128xbf16>, vector<16x128xf32> -> vector<16x128xf32>
    %c0_3 = arith.constant 0 : index
    %c0_4 = arith.constant 0 : index
    %3 = vector.load %arg3[%c0_3, %c0_4] : memref<1x128xf32, #tpu.memory_space<vmem>>, vector<1x128xf32>
    %4 = vector.broadcast %3 : vector<1x128xf32> to vector<16x128xf32>
    %5 = arith.addf %2, %4 : vector<16x128xf32>
    %cst_5 = arith.constant 5.000000e-01 : f32
    %6 = vector.broadcast %cst_5 : f32 to vector<16x128xf32>
    %7 = arith.mulf %6, %5 : vector<16x128xf32>
    %cst_6 = arith.constant 4.471500e-02 : f32
    %8 = vector.broadcast %cst_6 : f32 to vector<16x128xf32>
    %9 = arith.mulf %8, %5 : vector<16x128xf32>
    %10 = arith.mulf %9, %5 : vector<16x128xf32>
    %11 = arith.mulf %10, %5 : vector<16x128xf32>
    %12 = arith.addf %5, %11 : vector<16x128xf32>
    %cst_7 = arith.constant 0.797884583 : f32
    %13 = vector.broadcast %cst_7 : f32 to vector<16x128xf32>
    %14 = arith.mulf %13, %12 : vector<16x128xf32>
    %15 = math.tanh %14 : vector<16x128xf32>
    %cst_8 = arith.constant 1.000000e+00 : f32
    %16 = vector.broadcast %cst_8 : f32 to vector<16x128xf32>
    %17 = arith.addf %16, %15 : vector<16x128xf32>
    %18 = arith.mulf %7, %17 : vector<16x128xf32>
    %19 = arith.truncf %18 : vector<16x128xf32> to vector<16x128xbf16>
    %c0_9 = arith.constant 0 : index
    %c0_10 = arith.constant 0 : index
    %20 = vector.load %arg4[%c0_9, %c0_10] : memref<128x128xbf16, #tpu.memory_space<vmem>>, vector<128x128xbf16>
    %cst_11 = arith.constant dense<0.000000e+00> : vector<16x128xf32>
    %21 = tpu.matmul %19, %20, %cst_11 {dimension_numbers = #tpu.dot_dimension_numbers<[1], [0], [0], [1], [0, 0, 1, 1], [], []>} : vector<16x128xbf16>, vector<128x128xbf16>, vector<16x128xf32> -> vector<16x128xf32>
    %c0_12 = arith.constant 0 : index
    %c0_13 = arith.constant 0 : index
    %22 = vector.load %arg5[%c0_12, %c0_13] : memref<1x128xf32, #tpu.memory_space<vmem>>, vector<1x128xf32>
    %23 = vector.broadcast %22 : vector<1x128xf32> to vector<16x128xf32>
    %24 = arith.addf %21, %23 : vector<16x128xf32>
    %c0_14 = arith.constant 0 : index
    %c0_15 = arith.constant 0 : index
    %25 = vector.load %arg6[%c0_14, %c0_15] : memref<16x128xf32, #tpu.memory_space<vmem>>, vector<16x128xf32>
    tpu.vector_store %arg6[%c0_14, %c0_15], %24 {strides = array<i32>} : memref<16x128xf32, #tpu.memory_space<vmem>>, vector<16x128xf32>,
    return
  }
  func.func @transform_0(%arg0: i32) -> (i32, i32) {
    %c0_i32 = arith.constant 0 : i32
    %c0_i32_0 = arith.constant 0 : i32
    return %arg0, %c0_i32 : i32, i32
  }
  func.func @transform_1(%arg0: i32) -> (i32, i32) {
    %c0_i32 = arith.constant 0 : i32
    %c0_i32_0 = arith.constant 0 : i32
    %c0_i32_1 = arith.constant 0 : i32
    return %c0_i32, %c0_i32_0 : i32, i32
  }
  func.func @transform_2(%arg0: i32) -> (i32, i32) {
    %c0_i32 = arith.constant 0 : i32
    %c0_i32_0 = arith.constant 0 : i32
    %c0_i32_1 = arith.constant 0 : i32
    return %c0_i32, %c0_i32_0 : i32, i32
  }
  func.func @transform_3(%arg0: i32) -> (i32, i32) {
    %c0_i32 = arith.constant 0 : i32
    %c0_i32_0 = arith.constant 0 : i32
    %c0_i32_1 = arith.constant 0 : i32
    return %c0_i32, %c0_i32_0 : i32, i32
  }
  func.func @transform_4(%arg0: i32) -> (i32, i32) {
    %c0_i32 = arith.constant 0 : i32
    %c0_i32_0 = arith.constant 0 : i32
    %c0_i32_1 = arith.constant 0 : i32
    return %c0_i32, %c0_i32_0 : i32, i32
  }
  func.func @transform_5(%arg0: i32) -> (i32, i32) {
    %c0_i32 = arith.constant 0 : i32
    %c0_i32_0 = arith.constant 0 : i32
    return %arg0, %c0_i32 : i32, i32
  }
}

</mosaic_0001>

<bundles_post_ra>
// kernel: _ffn_impl.1
= control target key start
LH: loop header
LB: loop body
LE: loop exit
PB: predicated region body
PF: predicated region fallthrough
CT: control target
= control target key end

     0   :  { %10 = vsyncpa [#allocation3], 0  ;;  %s738_s0 = inlined_call_operand.hbm [shape: bf16[16,128], index: 0, kind: input, shape index: {}]   ;;  %s739_s1 = inlined_call_operand.hbm [shape: bf16[128,128], index: 1, kind: input, shape index: {}]   ;;  %s740_s2 = inlined_call_operand.hbm [shape: f32[1,128], index: 2, kind: input, shape index: {}]   ;;  %s741_s3 = inlined_call_operand.hbm [shape: bf16[128,128], index: 3, kind: input, shape index: {}]   ;;  %s742_s4 = inlined_call_operand.hbm [shape: f32[1,128], index: 4, kind: input, shape index: {}]   ;;  %s743_s5 = inlined_call_operand.hbm [shape: f32[16,128], index: 5, kind: output, shape index: {}]  }
   0x1   :  { %11 = vsyncpa [#allocation6], 0 }
   0x2   :  { %12 = vsyncpa [#allocation9], 0 }
   0x3   :  { %13 = vsyncpa [#allocation4], 0  ;;  %s608_s18 = smov [#allocation5]   ;;  %s609_s20 = smov [#allocation8]  }
   0x4   :  { %s31_s19 = sshll.u32 %s608_s18, 4  ;;  %s53_s21 = sshll.u32 %s609_s20, 4  ;;  %s32_s19 = int_to_ptr.vmem [resolvable:$true] %s31_s19  ;;  %s650_s21 = int_to_ptr.vmem [resolvable:$true] %s53_s21 }
   0x5   :  { %s468_s24 = scalar_lea.hbm %s739_s1, 1024 }
   0x6   :  { %p469_p0 = scmp.ne.s32.totalorder %s739_s1, %s468_s24  ;;  %p472_p1 = scmp.lt.u32.totalorder %s468_s24, %s739_s1 }
   0x8   :  { %p474_p2 = pnand %p472_p1, %p469_p0 }
   0xa   :  { %477 = shalt.err (!%p474_p2)
}
   0xb   :  { %s478_s29 = scalar_lea.vmem %s32_s19, 1024  ;;  %p483_p4 = scmp.lt.s32.totalorder %s32_s19, %s32_s19 }
   0xc   :  { %p479_p3 = scmp.ne.s32.totalorder %s32_s19, %s478_s29  ;;  %p484_p5 = scmp.lt.s32.totalorder %s478_s29, %s478_s29 }
   0xe   :  { %p485_p6 = por %p484_p5, %p483_p4 }
  0x10   :  { %p486_p7 = pnand %p485_p6, %p479_p3 }
  0x12   :  { %489 = shalt.err (!%p486_p7)
}
  0x13   :  { %s610_s30 = smov 64   ;;  %s611_s6 = smov 4  }
  0x14   :  { %37 = dma.hbm_to_vmem [thread:$0]  %s739_s1, 1024, %s32_s19, [#allocation6], %s610_s30, %s610_s30, %s611_s6  }
  0x15   :  { %s490_s11 = scalar_lea.hbm %s741_s3, 1024 }
  0x16   :  { %p491_p8 = scmp.ne.s32.totalorder %s741_s3, %s490_s11  ;;  %p494_p9 = scmp.lt.u32.totalorder %s490_s11, %s741_s3 }
  0x18   :  { %p496_p10 = pnand %p494_p9, %p491_p8 }
  0x1a   :  { %499 = shalt.err (!%p496_p10)
}
  0x1b   :  { %s500_s16 = scalar_lea.vmem %s650_s21, 1024  ;;  %p505_p12 = scmp.lt.s32.totalorder %s650_s21, %s650_s21 }
  0x1c   :  { %p501_p11 = scmp.ne.s32.totalorder %s650_s21, %s500_s16  ;;  %p506_p13 = scmp.lt.s32.totalorder %s500_s16, %s500_s16 }
  0x1e   :  { %p507_p0 = por %p506_p13, %p505_p12 }
  0x20   :  { %p508_p1 = pnand %p507_p0, %p501_p11 }
  0x22   :  { %511 = shalt.err (!%p508_p1)
}
  0x23   :  { %59 = dma.hbm_to_vmem [thread:$0]  %s741_s3, 1024, %s650_s21, [#allocation9], %s610_s30, %s610_s30, %s611_s6  }
  0x24   :  { %s612_s18 = smov [#allocation2]   ;;  %s613_s20 = smov [#allocation7]  }
  0x25   :  { %s19_s19 = sshll.u32 %s612_s18, 4  ;;  %s44_s22 = sshll.u32 %s613_s20, 4  ;;  %s20_s19 = int_to_ptr.vmem [resolvable:$true] %s19_s19  ;;  %s45_s22 = int_to_ptr.vmem [resolvable:$true] %s44_s22 }
  0x26   :  { %s512_s25 = scalar_lea.hbm %s738_s0, 128 }
  0x27   :  { %p513_p2 = scmp.ne.s32.totalorder %s738_s0, %s512_s25  ;;  %p516_p3 = scmp.lt.u32.totalorder %s512_s25, %s738_s0 }
  0x29   :  { %p518_p4 = pnand %p516_p3, %p513_p2 }
  0x2b   :  { %521 = shalt.err (!%p518_p4)
}
  0x2c   :  { %s522_s3 = scalar_lea.vmem %s20_s19, 128  ;;  %p527_p6 = scmp.lt.s32.totalorder %s20_s19, %s20_s19 }
  0x2d   :  { %p523_p5 = scmp.ne.s32.totalorder %s20_s19, %s522_s3  ;;  %p528_p7 = scmp.lt.s32.totalorder %s522_s3, %s522_s3 }
  0x2f   :  { %p529_p8 = por %p528_p7, %p527_p6 }
  0x31   :  { %p530_p9 = pnand %p529_p8, %p523_p5 }
  0x33   :  { %533 = shalt.err (!%p530_p9)
}
  0x34   :  { %25 = dma.hbm_to_vmem [thread:$0]  %s738_s0, 128, %s20_s19, [#allocation3], %s610_s30, %s610_s30, %s611_s6  }
  0x35   :  { %s534_s10 = scalar_lea.hbm %s740_s2, 16 }
  0x36   :  { %p535_p10 = scmp.ne.s32.totalorder %s740_s2, %s534_s10  ;;  %p538_p11 = scmp.lt.u32.totalorder %s534_s10, %s740_s2 }
  0x38   :  { %p540_p12 = pnand %p538_p11, %p535_p10 }
  0x3a   :  { %543 = shalt.err (!%p540_p12)
}
  0x3b   :  { %s544_s15 = scalar_lea.vmem %s45_s22, 16  ;;  %s548_s16 = scalar_lea.vmem %s45_s22, 32 }
  0x3c   :  { %p545_p13 = scmp.ne.s32.totalorder %s45_s22, %s544_s15  ;;  %p549_p0 = scmp.lt.s32.totalorder %s45_s22, %s45_s22 }
  0x3d   :  { %p550_p1 = scmp.lt.s32.totalorder %s548_s16, %s544_s15 }
  0x3f   :  { %p551_p2 = por %p550_p1, %p549_p0 }
  0x41   :  { %p552_p3 = pnand %p551_p2, %p545_p13 }
  0x43   :  { %555 = shalt.err (!%p552_p3)
}
  0x44   :  { %47 = dma.hbm_to_vmem [thread:$0]  %s740_s2, 16, %s45_s22, [#allocation6]  }
  0x45   :  { %s614_s6 = smov [#allocation10]   ;;  %s556_s19 = scalar_lea.hbm %s742_s4, 16 }
  0x46   :  { %s66_s1 = sshll.u32 %s614_s6, 4  ;;  %p557_p4 = scmp.ne.s32.totalorder %s742_s4, %s556_s19  ;;  %s67_s1 = int_to_ptr.vmem [resolvable:$true] %s66_s1 }
  0x47   :  { %p560_p5 = scmp.lt.u32.totalorder %s556_s19, %s742_s4 }
  0x49   :  { %p562_p6 = pnand %p560_p5, %p557_p4 }
  0x4b   :  { %565 = shalt.err (!%p562_p6)
}
  0x4c   :  { %s566_s26 = scalar_lea.vmem %s67_s1, 16  ;;  %s570_s2 = scalar_lea.vmem %s67_s1, 32 }
  0x4d   :  { %p567_p7 = scmp.ne.s32.totalorder %s67_s1, %s566_s26  ;;  %p571_p8 = scmp.lt.s32.totalorder %s67_s1, %s67_s1 }
  0x4e   :  { %p572_p9 = scmp.lt.s32.totalorder %s570_s2, %s566_s26 }
  0x50   :  { %p573_p10 = por %p572_p9, %p571_p8 }
  0x52   :  { %p574_p11 = pnand %p573_p10, %p567_p7 }
  0x54   :  { %577 = shalt.err (!%p574_p11)
}
  0x55   :  { %69 = dma.hbm_to_vmem [thread:$0]  %s742_s4, 16, %s67_s1, [#allocation9]  }
  0x56   :  { %600 = dma.done.wait [#allocation3], 128  }
  0x57   :  { %601 = vsyncadd [#allocation3], 4294967168 }
  0x58   :  { %602 = dma.done.wait [#allocation6], 1040  }
  0x59   :  { %603 = vsyncadd [#allocation6], 4294966256 }
  0x5a   :  { %604 = dma.done.wait [#allocation9], 1040  }
  0x5b   :  { %605 = vsyncadd [#allocation9], 4294966256  ;;  %v615_v0 = vmov 0.0   ;;  %vm616_vm0 = vmmov 0   ;;  %v447_v1 = vld [vmem:[#allocation5] sm:$0xff]   ;;  %v448_v2 = vld [vmem:[#allocation5 + $0x8] sm:$0xff]  }
  0x5c   :  { %395 = vmatprep.subr.bf16.mxu0 %v615_v0  ;;  %411 = vmatprep.mubr.msk.bf16.mxu0 %vm616_vm0, %v615_v0  ;;  %v449_v3 = vld [vmem:[#allocation5 + $0x10] sm:$0xff]   ;;  %v450_v4 = vld [vmem:[#allocation5 + $0x18] sm:$0xff]   ;;  %v451_v5 = vld [vmem:[#allocation5 + $0x20] sm:$0xff]   ;;  %s617_s4 = smov [#allocation11]  }
  0x5d   :  { %415 = vmatprep.subr.bf16.mxu1 %v615_v0  ;;  %431 = vmatprep.mubr.msk.bf16.mxu1 %vm616_vm0, %v615_v0  ;;  %v452_v6 = vld [vmem:[#allocation5 + $0x28] sm:$0xff]   ;;  %v453_v7 = vld [vmem:[#allocation5 + $0x30] sm:$0xff]   ;;  %v454_v8 = vld [vmem:[#allocation5 + $0x38] sm:$0xff]   ;;  %s344_s28 = sshll.u32 %s617_s4, 4  ;;  %s345_s28 = int_to_ptr.vmem [resolvable:$true] %s344_s28 }
  0x5e   :  { %396 = vmatpush3.bf16.msra.mxu0 %v447_v1  ;;  %v455_v9 = vld [vmem:[#allocation2] sm:$0xff]   ;;  %v456_v10 = vld [vmem:[#allocation8] sm:$0xff]   ;;  %v457_v11 = vld [vmem:[#allocation8 + $0x8] sm:$0xff]   ;;  %s578_s29 = scalar_lea.vmem %s345_s28, 256  ;;  %p583_p13 = scmp.lt.s32.totalorder %s345_s28, %s345_s28 }
  0x5f   :  { %397 = vmatprep.subr.bf16.mxu0 %v615_v0  ;;  %416 = vmatpush3.bf16.msra.mxu1 %v456_v10  ;;  %v458_v12 = vld [vmem:[#allocation8 + $0x10] sm:$0xff]   ;;  %v459_v13 = vld [vmem:[#allocation8 + $0x18] sm:$0xff]   ;;  %v460_v14 = vld [vmem:[#allocation8 + $0x20] sm:$0xff]   ;;  %p579_p12 = scmp.ne.s32.totalorder %s345_s28, %s578_s29  ;;  %p584_p0 = scmp.lt.s32.totalorder %s578_s29, %s578_s29 }
  0x60   :  { %417 = vmatprep.subr.bf16.mxu1 %v615_v0  ;;  %v461_v15 = vld [vmem:[#allocation8 + $0x28] sm:$0xff]   ;;  %v462_v16 = vld [vmem:[#allocation8 + $0x30] sm:$0xff]   ;;  %v463_v17 = vld [vmem:[#allocation8 + $0x38] sm:$0xff]  }
  0x61   :  { %v358_v18 = vld [vmem:[#allocation7] ss:$0 sm:$0xff]  ;;  %v368_v44 = vld [vmem:[#allocation10] ss:$0 sm:$0xff]  ;;  %p585_p1 = por %p584_p0, %p583_p13 }
  0x62   :  { %398 = vmatpush3.bf16.msra.mxu0 %v448_v2 }
  0x63   :  { %399 = vmatprep.subr.bf16.mxu0 %v615_v0  ;;  %418 = vmatpush3.bf16.msra.mxu1 %v457_v11  ;;  %p586_p2 = pnand %p585_p1, %p579_p12 }
  0x64   :  { %419 = vmatprep.subr.bf16.mxu1 %v615_v0 }
  0x66   :  { %400 = vmatpush3.bf16.msra.mxu0 %v449_v3 }
  0x67   :  { %401 = vmatprep.subr.bf16.mxu0 %v615_v0  ;;  %420 = vmatpush3.bf16.msra.mxu1 %v458_v12 }
  0x68   :  { %421 = vmatprep.subr.bf16.mxu1 %v615_v0 }
  0x6a   :  { %402 = vmatpush3.bf16.msra.mxu0 %v450_v4 }
  0x6b   :  { %403 = vmatprep.subr.bf16.mxu0 %v615_v0  ;;  %422 = vmatpush3.bf16.msra.mxu1 %v459_v13 }
  0x6c   :  { %423 = vmatprep.subr.bf16.mxu1 %v615_v0 }
  0x6e   :  { %404 = vmatpush3.bf16.msra.mxu0 %v451_v5 }
  0x6f   :  { %405 = vmatprep.subr.bf16.mxu0 %v615_v0  ;;  %424 = vmatpush3.bf16.msra.mxu1 %v460_v14 }
  0x70   :  { %425 = vmatprep.subr.bf16.mxu1 %v615_v0 }
  0x72   :  { %406 = vmatpush3.bf16.msra.mxu0 %v452_v6 }
  0x73   :  { %407 = vmatprep.subr.bf16.mxu0 %v615_v0  ;;  %426 = vmatpush3.bf16.msra.mxu1 %v461_v15 }
  0x74   :  { %427 = vmatprep.subr.bf16.mxu1 %v615_v0 }
  0x76   :  { %408 = vmatpush3.bf16.msra.mxu0 %v453_v7 }
  0x77   :  { %409 = vmatprep.subr.bf16.mxu0 %v615_v0  ;;  %428 = vmatpush3.bf16.msra.mxu1 %v462_v16 }
  0x78   :  { %429 = vmatprep.subr.bf16.mxu1 %v615_v0 }
  0x7a   :  { %410 = vmatpush3.bf16.msra.mxu0 %v454_v8 }
  0x7b   :  { %430 = vmatpush3.bf16.msra.mxu1 %v463_v17 }
  0x7d   :  { %412 = vmatmul.mubr.bf16.vlgmr.msra.gmra.mrb[0].mxu0 %v455_v9 }
 0x150   :  { %v199_v19 = vpop.f32.mrb[0].mxu0 }
 0x151   :  { %v200_v20 = vadd.f32 %v358_v18, %v199_v19  ;;  %v413_v21 = vpop.f32.mrb[1].mxu0 }
 0x152   :  { %v202_v22 = vpop.f32.mrb[2].mxu0 }
 0x153   :  { %v208_v23 = vmul.f32 0.044715, %v200_v20  ;;  %v203_v24 = vadd.f32 %v358_v18, %v202_v22  ;;  %v414_v25 = vpop.f32.mrb[3].mxu0  ;;  %v206_v38 = vmul.f32 0.5, %v200_v20 }
 0x155   :  { %v210_v26 = vmul.f32 %v208_v23, %v200_v20  ;;  %v209_v27 = vmul.f32 0.044715, %v203_v24  ;;  %v207_v39 = vmul.f32 0.5, %v203_v24 }
 0x157   :  { %v212_v28 = vmul.f32 %v210_v26, %v200_v20  ;;  %v211_v29 = vmul.f32 %v209_v27, %v203_v24 }
 0x159   :  { %v213_v30 = vmul.f32 %v211_v29, %v203_v24  ;;  %v214_v31 = vadd.f32 %v212_v28, %v200_v20 }
 0x15b   :  { %v215_v32 = vadd.f32 %v213_v30, %v203_v24  ;;  %v216_v33 = vmul.f32 0.7978846, %v214_v31 }
 0x15d   :  { %v217_v34 = vmul.f32 0.7978846, %v215_v32  ;;  %464 = vtanh.f32 %v216_v33 }
 0x15f   :  { %466 = vtanh.f32 %v217_v34 }
 0x167   :  { %v465_v35 = vpop.eup %464 }
 0x168   :  { %v220_v36 = vadd.f32 1.0, %v465_v35 }
 0x169   :  { %v467_v37 = vpop.eup %466 }
 0x16a   :  { %v221_v40 = vadd.f32 1.0, %v467_v37  ;;  %v222_v41 = vmul.f32 %v220_v36, %v206_v38 }
 0x16c   :  { %v223_v42 = vmul.f32 %v221_v40, %v207_v39 }
 0x16e   :  { %v224_v43 = vpack.c.bf16 %v223_v42, %v222_v41 }
 0x170   :  { %432 = vmatmul.mubr.bf16.vlgmr.msra.gmra.mrb[0].mxu1 %v224_v43 }
 0x243   :  { %v330_v45 = vpop.f32.mrb[0].mxu1 }
 0x244   :  { %v331_v46 = vadd.f32 %v368_v44, %v330_v45  ;;  %v433_v47 = vpop.f32.mrb[1].mxu1 }
 0x245   :  { %v333_v48 = vpop.f32.mrb[2].mxu1 }
 0x246   :  { %337 = vst [vmem:[#allocation11] sm:$0xff] %v331_v46  ;;  %v334_v49 = vadd.f32 %v368_v44, %v333_v48  ;;  %v434_v50 = vpop.f32.mrb[3].mxu1 }
 0x248   :  { %338 = vst [vmem:[#allocation11 + $0x8] sm:$0xff] %v334_v49 }
 0x249   :  { %589 = shalt.err (!%p586_p2)
}
 0x24a   :  { %s590_s7 = scalar_lea.hbm %s743_s5, 256 }
 0x24b   :  { %p591_p3 = scmp.ne.s32.totalorder %s743_s5, %s590_s7  ;;  %p594_p4 = scmp.lt.u32.totalorder %s590_s7, %s743_s5 }
 0x24d   :  { %p596_p5 = pnand %p594_p4, %p591_p3 }
 0x24f   :  { %599 = shalt.err (!%p596_p5)
}
 0x250   :  { %s618_s12 = smov 128   ;;  %s619_s13 = smov 8  }
 0x251   :  { %350 = dma.vmem_to_hbm [thread:$0]  %s345_s28, 256, %s743_s5, [#allocation4], %s618_s12, %s618_s12, %s619_s13  }
 0x252   :  { %606 = dma.done.wait [#allocation4], 256  }
 0x253   :  { %607 = vsyncadd [#allocation4], 4294967040 }
 0x254   :  { %354 = vsyncpa [#allocation3], 1 }
 0x255   :  { %355 = vsyncpa [#allocation6], 1 }
 0x256   :  { %356 = vsyncpa [#allocation9], 1 }
 0x257   :  { %357 = vsyncpa [#allocation4], 1 }

</bundles_post_ra>
